<compile_context>
chip_gen: v7x
topology: tpu7x:2x2x1
jax: 0.10.0
libtpu: 0.0.40
codegen_flags: <defaults>
</compile_context>

<pallas_src>
import functools

import jax
import jax.numpy as jnp
from jax.experimental import pallas as pl
from jax.experimental.pallas import tpu as pltpu


# --------------------------------------------------------------------------- #
# Fused per-graph kernel: pi|vf GCN + pi|vf MlpExtractor + heads + DiagGaussian.
# --------------------------------------------------------------------------- #
def fused_policy_kernel(h_ref, a_ref, noise_ref, wp1_ref, wp2_ref, wh_ref, b_ref,
                        out_ref, *, F, DG2, H2, A):
    f32 = jnp.float32
    h = h_ref[...]            # (N, F)   this graph's node features
    a = a_ref[...]            # (N, N)   row-normalized adjacency (self loops)
    noise = noise_ref[...]    # (1, A)   reparameterization noise

    # ---- unpack weights (static, sublane-aligned slices of the VMEM packs) --
    wg1 = wp1_ref[0:F, :]                       # (F, 2Dg)   pi||vf GCN layer-1
    wg2 = wp1_ref[F:F + DG2, :]                 # (2Dg, 2Dg) blkdiag GCN layer-2
    w1g = wp2_ref[0:DG2, :]                     # (2Dg, 2H)  blkdiag MLP-1 (graph part)
    w2 = wp2_ref[DG2:DG2 + H2, :]               # (2H, 2H)   blkdiag MLP-2
    w1rs = wp2_ref[DG2 + H2:DG2 + H2 + F, :]    # (F, 2H)    MLP-1 robot-state part
                                                #            (nonzero only at rows 4:9)
    whead = wh_ref[...]                         # (2H, 128)  [action_net | value_net | 0]

    bg1 = b_ref[0:1, 0:DG2]
    bg2 = b_ref[1:2, 0:DG2]
    b1 = b_ref[2:3, 0:H2]
    b2 = b_ref[3:4, 0:H2]
    bhead = b_ref[4:5, 0:128]                   # [ba | bv | 0 ...] lane-padded
    log_std = b_ref[5:6, 0:A]

    # ---- fused pi|vf GCN feature extractors (one lane-packed chain) ---------
    x = jnp.dot(h, wg1, preferred_element_type=f32)                     # (N, 2Dg)
    h1 = jnp.tanh(jnp.dot(a, x, preferred_element_type=f32) + bg1)      # (N, 2Dg)
    # Layer 2: only the robot node (node 0) is consumed downstream, so
    # aggregate its row first, then apply the block-diagonal transform.
    agg0 = jnp.dot(a[0:1, :], h1, preferred_element_type=f32)           # (1, 2Dg)
    g = jnp.tanh(jnp.dot(agg0, wg2, preferred_element_type=f32) + bg2)  # (1, 2Dg)

    # ---- fused pi|vf MlpExtractor (Tanh). concat([robot_state, graph_emb])
    # is folded into two split matmuls; the robot-state rows of w1rs live at
    # node-feature columns 4:9, so h[0, :] is used directly.
    l1 = jnp.tanh(jnp.dot(h[0:1, :], w1rs, preferred_element_type=f32)
                  + jnp.dot(g, w1g, preferred_element_type=f32) + b1)   # (1, 2H)
    l2 = jnp.tanh(jnp.dot(l1, w2, preferred_element_type=f32) + b2)     # (1, 2H)

    # ---- fused action_net | value_net head, lane-padded to 128 columns:
    # head = [mean_actions (A) | value (1) | zeros].
    head = jnp.dot(l2, whead, preferred_element_type=f32) + bhead       # (1, 128)

    # ---- DiagGaussian reparameterized sample + log_prob.
    # z = (actions - mean) / std == noise exactly, so use noise directly.
    # (With deterministic=True the wrapper passes noise = 0, i.e. log_prob is
    #  the density at the mean -- intentional, matches SB3 usage.)
    std = jnp.exp(log_std)
    logp = jnp.sum(-0.5 * noise * noise - log_std - 0.5 * jnp.log(2.0 * jnp.pi),
                   axis=-1, keepdims=True)                              # (1, 1)

    parts = [std * noise,                 # adds to mean -> actions
             jnp.zeros((1, 1), f32),      # value column unchanged
             logp]                        # log_prob column
    pad = 128 - (A + 2)
    if pad > 0:
        parts.append(jnp.zeros((1, pad), f32))
    addend = jnp.concatenate(parts, axis=-1)                            # (1, 128)

    # Single lane-dense 128-wide store: [actions | value | log_prob | 0 ...].
    out_ref[...] = head + addend


# --------------------------------------------------------------------------- #
# Full forward pass (share_features_extractor=False path).
# --------------------------------------------------------------------------- #
@functools.partial(jax.jit, static_argnames=("deterministic",))
def graph_actor_critic_forward(h, a, packed, noise, deterministic=False):
    """Returns (actions (B, A), values (B, 1), log_prob (B,))."""
    B, N, F = h.shape
    A = noise.shape[-1]
    assert A + 2 <= 128, "packed output layout assumes action_dim + 2 <= 128"

    wp1, wp2, whead, bias = packed["wp1"], packed["wp2"], packed["whead"], packed["bias"]
    DG2 = wp1.shape[1]          # 2 * graph feature dim
    H2 = wp2.shape[1]           # 2 * mlp hidden dim

    if deterministic:
        noise = jnp.zeros_like(noise)
    noise3 = noise.reshape(B, 1, A)

    kernel = functools.partial(fused_policy_kernel, F=F, DG2=DG2, H2=H2, A=A)

    flops = 2 * B * (N * F * DG2 + N * N * DG2 + N * DG2 + DG2 * DG2
                     + F * H2 + DG2 * H2 + H2 * H2 + H2 * 128)
    transcendentals = B * (N * DG2 + DG2 + 2 * H2 + A)
    bytes_accessed = 4 * (h.size + a.size + noise3.size + wp1.size + wp2.size
                          + whead.size + bias.size + B * 128)

    packed_out = pl.pallas_call(
        kernel,
        grid=(B,),
        out_shape=jax.ShapeDtypeStruct((B, 1, 128), jnp.float32),
        in_specs=[
            pl.BlockSpec((None, N, F), lambda b: (b, 0, 0)),     # h       (per graph)
            pl.BlockSpec((None, N, N), lambda b: (b, 0, 0)),     # adj     (per graph)
            pl.BlockSpec((None, 1, A), lambda b: (b, 0, 0)),     # noise   (per graph)
            pl.BlockSpec(wp1.shape, lambda b: (0, 0)),           # GCN weight pack
            pl.BlockSpec(wp2.shape, lambda b: (0, 0)),           # MLP weight pack
            pl.BlockSpec(whead.shape, lambda b: (0, 0)),         # head weight pack
            pl.BlockSpec(bias.shape, lambda b: (0, 0)),          # bias / log_std pack
        ],
        out_specs=pl.BlockSpec((None, 1, 128), lambda b: (b, 0, 0)),
        compiler_params=pltpu.CompilerParams(
            dimension_semantics=("parallel",),          # shards graphs on v7x's 2 TCs
            vmem_limit_bytes=32 * 1024 * 1024),
        cost_estimate=pl.CostEstimate(flops=flops,
                                      transcendentals=transcendentals,
                                      bytes_accessed=bytes_accessed),
    )(h, a, noise3, wp1, wp2, whead, bias)

    out = packed_out[:, 0, :]
    actions = out[:, :A]
    values = out[:, A:A + 1]
    log_prob = out[:, A + 1]
    # actions.reshape((-1, *action_space.shape)) is already (B, action_dim)
    return actions, values, log_prob


# --------------------------------------------------------------------------- #
# Deterministic parameter initialization (orthogonal init as in PPO/A2C).
# --------------------------------------------------------------------------- #
def _ortho(key, shape, gain):
    return jax.nn.initializers.orthogonal(scale=gain)(key, shape, jnp.float32)


def make_params(key, node_feat, graph_dim, hidden, action_dim):
    # TODO(synk): exact DGL GraphExtractor message-passing is not available in
    # the reference source; a 2-layer dense GCN stands in for it.
    keys = jax.random.split(key, 10)
    sqrt2 = float(jnp.sqrt(2.0))
    feat_dim = graph_dim + 5          # features_extractor.features_dim + 5
    z = lambda d: jnp.zeros((1, d), jnp.float32)

    pi_gcn = dict(w1=_ortho(keys[0], (node_feat, graph_dim), sqrt2), b1=z(graph_dim),
                  w2=_ortho(keys[1], (graph_dim, graph_dim), sqrt2), b2=z(graph_dim))
    vf_gcn = dict(w1=_ortho(keys[2], (node_feat, graph_dim), sqrt2), b1=z(graph_dim),
                  w2=_ortho(keys[3], (graph_dim, graph_dim), sqrt2), b2=z(graph_dim))

    # mlp_extractor first layers are initialized as single orthogonal matrices
    # over the concatenated (robot_state, graph_emb) input, then stored split.
    w1p = _ortho(keys[4], (feat_dim, hidden), sqrt2)
    w1v = _ortho(keys[6], (feat_dim, hidden), sqrt2)
    heads = dict(
        w1p_rs=w1p[:5], w1p_g=w1p[5:], b1p=z(hidden),
        w2p=_ortho(keys[5], (hidden, hidden), sqrt2), b2p=z(hidden),
        w1v_rs=w1v[:5], w1v_g=w1v[5:], b1v=z(hidden),
        w2v=_ortho(keys[7], (hidden, hidden), sqrt2), b2v=z(hidden),
        # action_net (gain 0.01), value_net (gain 1)
        wa=_ortho(keys[8], (hidden, action_dim), 0.01), ba=z(action_dim),
        wv=_ortho(keys[9], (hidden, 1), 1.0), bv=z(1),
        # log_std parameter, log_std_init = 0.0
        log_std=jnp.zeros((1, action_dim), jnp.float32),
    )
    return dict(pi_gcn=pi_gcn, vf_gcn=vf_gcn, heads=heads)


def pack_params(params):
    """Pack all weights/biases into 4 lane-friendly tensors (done once)."""
    f32 = jnp.float32
    pg, vg, hp = params["pi_gcn"], params["vf_gcn"], params["heads"]
    F, Dg = pg["w1"].shape
    H = hp["w2p"].shape[0]
    A = hp["wa"].shape[1]

    def blkdiag(x, y):
        z1 = jnp.zeros((x.shape[0], y.shape[1]), f32)
        z2 = jnp.zeros((y.shape[0], x.shape[1]), f32)
        return jnp.concatenate(
            [jnp.concatenate([x, z1], axis=1), jnp.concatenate([z2, y], axis=1)], axis=0)

    # GCN pack: layer-1 lane-concatenated, layer-2 block-diagonal.
    wg1 = jnp.concatenate([pg["w1"], vg["w1"]], axis=1)          # (F, 2Dg)
    wg2 = blkdiag(pg["w2"], vg["w2"])                            # (2Dg, 2Dg)
    wp1 = jnp.concatenate([wg1, wg2], axis=0)                    # (F+2Dg, 2Dg)

    # MLP pack.  w1rs is expanded to all F node-feature columns with the 5
    # robot-state rows placed at columns 4:9 (so the kernel uses h[0, :]).
    w1g = blkdiag(hp["w1p_g"], hp["w1v_g"])                      # (2Dg, 2H)
    w2 = blkdiag(hp["w2p"], hp["w2v"])                           # (2H, 2H)
    w1rs = jnp.zeros((F, 2 * H), f32)
    w1rs = w1rs.at[4:9].set(jnp.concatenate([hp["w1p_rs"], hp["w1v_rs"]], axis=1))
    wp2 = jnp.concatenate([w1g, w2, w1rs], axis=0)               # (2Dg+2H+F, 2H)

    # Head pack, lane-padded to 128 output columns: [action_net | value_net | 0].
    whead = jnp.zeros((2 * H, 128), f32)
    whead = whead.at[:H, :A].set(hp["wa"])
    whead = whead.at[H:, A:A + 1].set(hp["wv"])

    # Bias / scalar pack (one small 2-D array, every slice starts at lane 0).
    W = max(128, 2 * Dg, 2 * H)
    bias = jnp.zeros((8, W), f32)
    bias = bias.at[0, :2 * Dg].set(jnp.concatenate([pg["b1"], vg["b1"]], axis=1)[0])
    bias = bias.at[1, :2 * Dg].set(jnp.concatenate([pg["b2"], vg["b2"]], axis=1)[0])
    bias = bias.at[2, :2 * H].set(jnp.concatenate([hp["b1p"], hp["b1v"]], axis=1)[0])
    bias = bias.at[3, :2 * H].set(jnp.concatenate([hp["b2p"], hp["b2v"]], axis=1)[0])
    bias = bias.at[4, :A].set(hp["ba"][0])
    bias = bias.at[4, A:A + 1].set(hp["bv"][0])
    bias = bias.at[5, :A].set(hp["log_std"][0])
    return dict(wp1=wp1, wp2=wp2, whead=whead, bias=bias)


# --------------------------------------------------------------------------- #
# Pure-JAX reference of the same forward (for a numeric cross-check).
# --------------------------------------------------------------------------- #
def reference_forward(h, a, params, noise):
    rs = h[:, 0, 4:9]

    def gcn_node0(p):
        x = jnp.einsum("bnf,fd->bnd", h, p["w1"])
        h1 = jnp.tanh(jnp.einsum("bnm,bmd->bnd", a, x) + p["b1"])
        x2 = jnp.einsum("bnd,de->bne", h1, p["w2"])
        h2 = jnp.tanh(jnp.einsum("bnm,bme->bne", a, x2) + p["b2"])
        return h2[:, 0, :]

    g_pi = gcn_node0(params["pi_gcn"])
    g_vf = gcn_node0(params["vf_gcn"])
    hp = params["heads"]
    pf = jnp.concatenate([rs, g_pi], axis=1)
    vf = jnp.concatenate([rs, g_vf], axis=1)
    w1p = jnp.concatenate([hp["w1p_rs"], hp["w1p_g"]], axis=0)
    w1v = jnp.concatenate([hp["w1v_rs"], hp["w1v_g"]], axis=0)
    lp = jnp.tanh(pf @ w1p + hp["b1p"])
    lp = jnp.tanh(lp @ hp["w2p"] + hp["b2p"])
    lv = jnp.tanh(vf @ w1v + hp["b1v"])
    lv = jnp.tanh(lv @ hp["w2v"] + hp["b2v"])
    mean = lp @ hp["wa"] + hp["ba"]
    values = lv @ hp["wv"] + hp["bv"]
    std = jnp.exp(hp["log_std"])
    actions = mean + std * noise
    logp = jnp.sum(-0.5 * noise * noise - hp["log_std"] - 0.5 * jnp.log(2.0 * jnp.pi),
                   axis=-1)
    return actions, values, logp


# --------------------------------------------------------------------------- #
if __name__ == "__main__":
    B, N, F = 2, 8, 16         # 2 graphs, 8 nodes each, 16-d node features
    Dg, hidden, A = 32, 64, 2  # graph feature dim, mlp hidden, Box action dim

    key = jax.random.PRNGKey(0)
    k_h, k_a, k_p, k_n = jax.random.split(key, 4)

    # dense node features and row-normalized adjacency (with self-loops)
    h = jax.random.normal(k_h, (B, N, F), dtype=jnp.float32)
    adj = (jax.random.uniform(k_a, (B, N, N)) > 0.5).astype(jnp.float32)
    adj = adj + jnp.eye(N, dtype=jnp.float32)[None]
    adj = adj / jnp.sum(adj, axis=-1, keepdims=True)

    params = make_params(k_p, F, Dg, hidden, A)
    packed = pack_params(params)
    noise = jax.random.normal(k_n, (B, A), dtype=jnp.float32)

    actions, values, log_prob = graph_actor_critic_forward(
        h, adj, packed, noise, deterministic=False)
    jax.block_until_ready((actions, values, log_prob))

    assert actions.shape == (B, A)
    assert values.shape == (B, 1)
    assert log_prob.shape == (B,)

    # numeric cross-check against the pure-JAX reference
    ra, rv, rl = reference_forward(h, adj, params, noise)
    assert jnp.allclose(actions, ra, rtol=2e-2, atol=2e-3), "actions mismatch"
    assert jnp.allclose(values, rv, rtol=2e-2, atol=2e-3), "values mismatch"
    assert jnp.allclose(log_prob, rl, rtol=2e-2, atol=2e-3), "log_prob mismatch"

    print("KERNEL_OK")
</pallas_src>

<mosaic_0001>
module attributes {stable_mosaic.version = 11 : i64} {
  func.func @fused_policy_kernel(%arg0: i32, %arg1: memref<1x8x16xf32, #tpu.memory_space<vmem>>, %arg2: memref<1x8x8xf32, #tpu.memory_space<vmem>>, %arg3: memref<1x1x2xf32, #tpu.memory_space<vmem>>, %arg4: memref<80x64xf32, #tpu.memory_space<vmem>>, %arg5: memref<208x128xf32, #tpu.memory_space<vmem>>, %arg6: memref<128x128xf32, #tpu.memory_space<vmem>>, %arg7: memref<8x128xf32, #tpu.memory_space<vmem>>, %arg8: memref<1x1x128xf32, #tpu.memory_space<vmem>>) attributes {dimension_semantics = [#tpu.dimension_semantics<parallel>], iteration_bounds = array<i64: 2>, scalar_prefetch = 0 : i64, scratch_operands = 0 : i64, tpu.core_type = #tpu.core_type<tc>, window_params = [{transform_indices = @transform_0, window_bounds = array<i64: 1, 8, 16>}, {transform_indices = @transform_1, window_bounds = array<i64: 1, 8, 8>}, {transform_indices = @transform_2, window_bounds = array<i64: 1, 1, 2>}, {pipeline_mode = #tpu.pipeline_mode<synchronous>, transform_indices = @transform_3, window_bounds = array<i64: 80, 64>}, {pipeline_mode = #tpu.pipeline_mode<synchronous>, transform_indices = @transform_4, window_bounds = array<i64: 208, 128>}, {pipeline_mode = #tpu.pipeline_mode<synchronous>, transform_indices = @transform_5, window_bounds = array<i64: 128, 128>}, {pipeline_mode = #tpu.pipeline_mode<synchronous>, transform_indices = @transform_6, window_bounds = array<i64: 8, 128>}, {transform_indices = @transform_7, window_bounds = array<i64: 1, 1, 128>}]} {
    %c0 = arith.constant 0 : index
    %c0_0 = arith.constant 0 : index
    %c0_1 = arith.constant 0 : index
    %0 = vector.load %arg1[%c0, %c0_0, %c0_1] : memref<1x8x16xf32, #tpu.memory_space<vmem>>, vector<1x8x16xf32>
    %1 = vector.shape_cast %0 : vector<1x8x16xf32> to vector<8x16xf32>
    %c0_2 = arith.constant 0 : index
    %c0_3 = arith.constant 0 : index
    %c0_4 = arith.constant 0 : index
    %2 = vector.load %arg2[%c0_2, %c0_3, %c0_4] : memref<1x8x8xf32, #tpu.memory_space<vmem>>, vector<1x8x8xf32>
    %3 = vector.shape_cast %2 : vector<1x8x8xf32> to vector<8x8xf32>
    %c0_5 = arith.constant 0 : index
    %c0_6 = arith.constant 0 : index
    %c0_7 = arith.constant 0 : index
    %4 = vector.load %arg3[%c0_5, %c0_6, %c0_7] : memref<1x1x2xf32, #tpu.memory_space<vmem>>, vector<1x1x2xf32>
    %5 = vector.shape_cast %4 : vector<1x1x2xf32> to vector<1x2xf32>
    %c0_8 = arith.constant 0 : index
    %c0_9 = arith.constant 0 : index
    %6 = vector.load %arg4[%c0_8, %c0_9] : memref<80x64xf32, #tpu.memory_space<vmem>>, vector<16x64xf32>
    %c16 = arith.constant 16 : index
    %c0_10 = arith.constant 0 : index
    %7 = vector.load %arg4[%c16, %c0_10] : memref<80x64xf32, #tpu.memory_space<vmem>>, vector<64x64xf32>
    %c0_11 = arith.constant 0 : index
    %c0_12 = arith.constant 0 : index
    %8 = vector.load %arg5[%c0_11, %c0_12] : memref<208x128xf32, #tpu.memory_space<vmem>>, vector<64x128xf32>
    %c64 = arith.constant 64 : index
    %c0_13 = arith.constant 0 : index
    %9 = vector.load %arg5[%c64, %c0_13] : memref<208x128xf32, #tpu.memory_space<vmem>>, vector<128x128xf32>
    %c192 = arith.constant 192 : index
    %c0_14 = arith.constant 0 : index
    %10 = vector.load %arg5[%c192, %c0_14] : memref<208x128xf32, #tpu.memory_space<vmem>>, vector<16x128xf32>
    %c0_15 = arith.constant 0 : index
    %c0_16 = arith.constant 0 : index
    %11 = vector.load %arg6[%c0_15, %c0_16] : memref<128x128xf32, #tpu.memory_space<vmem>>, vector<128x128xf32>
    %c0_17 = arith.constant 0 : index
    %c0_18 = arith.constant 0 : index
    %12 = vector.load %arg7[%c0_17, %c0_18] : memref<8x128xf32, #tpu.memory_space<vmem>>, vector<1x64xf32>
    %c1 = arith.constant 1 : index
    %c0_19 = arith.constant 0 : index
    %13 = vector.load %arg7[%c1, %c0_19] : memref<8x128xf32, #tpu.memory_space<vmem>>, vector<1x64xf32>
    %c2 = arith.constant 2 : index
    %c0_20 = arith.constant 0 : index
    %14 = vector.load %arg7[%c2, %c0_20] : memref<8x128xf32, #tpu.memory_space<vmem>>, vector<1x128xf32>
    %c3 = arith.constant 3 : index
    %c0_21 = arith.constant 0 : index
    %15 = vector.load %arg7[%c3, %c0_21] : memref<8x128xf32, #tpu.memory_space<vmem>>, vector<1x128xf32>
    %c4 = arith.constant 4 : index
    %c0_22 = arith.constant 0 : index
    %16 = vector.load %arg7[%c4, %c0_22] : memref<8x128xf32, #tpu.memory_space<vmem>>, vector<1x128xf32>
    %c5 = arith.constant 5 : index
    %c0_23 = arith.constant 0 : index
    %17 = vector.load %arg7[%c5, %c0_23] : memref<8x128xf32, #tpu.memory_space<vmem>>, vector<1x2xf32>
    %cst = arith.constant dense<0.000000e+00> : vector<8x64xf32>
    %18 = tpu.matmul %1, %6, %cst {dimension_numbers = #tpu.dot_dimension_numbers<[1], [0], [0], [1], [0, 0, 1, 1], [], []>} : vector<8x16xf32>, vector<16x64xf32>, vector<8x64xf32> -> vector<8x64xf32>
    %cst_24 = arith.constant dense<0.000000e+00> : vector<8x64xf32>
    %19 = tpu.matmul %3, %18, %cst_24 {dimension_numbers = #tpu.dot_dimension_numbers<[1], [0], [0], [1], [0, 0, 1, 1], [], []>} : vector<8x8xf32>, vector<8x64xf32>, vector<8x64xf32> -> vector<8x64xf32>
    %20 = vector.broadcast %12 : vector<1x64xf32> to vector<8x64xf32>
    %21 = arith.addf %19, %20 : vector<8x64xf32>
    %22 = math.tanh %21 : vector<8x64xf32>
    %23 = vector.extract_strided_slice %3 {offsets = [0, 0], sizes = [1, 8], strides = [1, 1]} : vector<8x8xf32> to vector<1x8xf32>
    %cst_25 = arith.constant dense<0.000000e+00> : vector<1x64xf32>
    %24 = tpu.matmul %23, %22, %cst_25 {dimension_numbers = #tpu.dot_dimension_numbers<[1], [0], [0], [1], [0, 0, 1, 1], [], []>} : vector<1x8xf32>, vector<8x64xf32>, vector<1x64xf32> -> vector<1x64xf32>
    %cst_26 = arith.constant dense<0.000000e+00> : vector<1x64xf32>
    %25 = tpu.matmul %24, %7, %cst_26 {dimension_numbers = #tpu.dot_dimension_numbers<[1], [0], [0], [1], [0, 0, 1, 1], [], []>} : vector<1x64xf32>, vector<64x64xf32>, vector<1x64xf32> -> vector<1x64xf32>
    %26 = arith.addf %25, %13 : vector<1x64xf32>
    %27 = math.tanh %26 : vector<1x64xf32>
    %28 = vector.extract_strided_slice %1 {offsets = [0, 0], sizes = [1, 16], strides = [1, 1]} : vector<8x16xf32> to vector<1x16xf32>
    %cst_27 = arith.constant dense<0.000000e+00> : vector<1x128xf32>
    %29 = tpu.matmul %28, %10, %cst_27 {dimension_numbers = #tpu.dot_dimension_numbers<[1], [0], [0], [1], [0, 0, 1, 1], [], []>} : vector<1x16xf32>, vector<16x128xf32>, vector<1x128xf32> -> vector<1x128xf32>
    %cst_28 = arith.constant dense<0.000000e+00> : vector<1x128xf32>
    %30 = tpu.matmul %27, %8, %cst_28 {dimension_numbers = #tpu.dot_dimension_numbers<[1], [0], [0], [1], [0, 0, 1, 1], [], []>} : vector<1x64xf32>, vector<64x128xf32>, vector<1x128xf32> -> vector<1x128xf32>
    %31 = arith.addf %29, %30 : vector<1x128xf32>
    %32 = arith.addf %31, %14 : vector<1x128xf32>
    %33 = math.tanh %32 : vector<1x128xf32>
    %cst_29 = arith.constant dense<0.000000e+00> : vector<1x128xf32>
    %34 = tpu.matmul %33, %9, %cst_29 {dimension_numbers = #tpu.dot_dimension_numbers<[1], [0], [0], [1], [0, 0, 1, 1], [], []>} : vector<1x128xf32>, vector<128x128xf32>, vector<1x128xf32> -> vector<1x128xf32>
    %35 = arith.addf %34, %15 : vector<1x128xf32>
    %36 = math.tanh %35 : vector<1x128xf32>
    %cst_30 = arith.constant dense<0.000000e+00> : vector<1x128xf32>
    %37 = tpu.matmul %36, %11, %cst_30 {dimension_numbers = #tpu.dot_dimension_numbers<[1], [0], [0], [1], [0, 0, 1, 1], [], []>} : vector<1x128xf32>, vector<128x128xf32>, vector<1x128xf32> -> vector<1x128xf32>
    %38 = arith.addf %37, %16 : vector<1x128xf32>
    %39 = math.exp %17 : vector<1x2xf32>
    %cst_31 = arith.constant -5.000000e-01 : f32
    %40 = vector.broadcast %cst_31 : f32 to vector<1x2xf32>
    %41 = arith.mulf %40, %5 : vector<1x2xf32>
    %42 = arith.mulf %41, %5 : vector<1x2xf32>
    %43 = arith.subf %42, %17 : vector<1x2xf32>
    %cst_32 = arith.constant 6.28318548 : f32
    %44 = math.log %cst_32 : f32
    %cst_33 = arith.constant 5.000000e-01 : f32
    %45 = arith.mulf %cst_33, %44 : f32
    %46 = vector.broadcast %45 : f32 to vector<1x2xf32>
    %47 = arith.subf %43, %46 : vector<1x2xf32>
    %cst_34 = arith.constant dense<0.000000e+00> : vector<1xf32>
    %48 = vector.multi_reduction <add>, %47, %cst_34 [1] : vector<1x2xf32> to vector<1xf32>
    %49 = vector.shape_cast %48 : vector<1xf32> to vector<1x1xf32>
    %50 = arith.mulf %39, %5 : vector<1x2xf32>
    %cst_35 = arith.constant 0.000000e+00 : f32
    %51 = vector.broadcast %cst_35 : f32 to vector<1x1xf32>
    %cst_36 = arith.constant 0.000000e+00 : f32
    %52 = vector.broadcast %cst_36 : f32 to vector<1x124xf32>
    %53 = tpu.concatenate %50, %51, %49, %52 in 1 : vector<1x2xf32>, vector<1x1xf32>, vector<1x1xf32>, vector<1x124xf32> -> vector<1x128xf32>
    %54 = arith.addf %38, %53 : vector<1x128xf32>
    %c0_37 = arith.constant 0 : index
    %c0_38 = arith.constant 0 : index
    %c0_39 = arith.constant 0 : index
    %55 = vector.load %arg8[%c0_37, %c0_38, %c0_39] : memref<1x1x128xf32, #tpu.memory_space<vmem>>, vector<1x1x128xf32>
    %56 = vector.shape_cast %55 : vector<1x1x128xf32> to vector<1x128xf32>
    %57 = vector.shape_cast %54 : vector<1x128xf32> to vector<1x1x128xf32>
    tpu.vector_store %arg8[%c0_37, %c0_38, %c0_39], %57 {strides = array<i32>} : memref<1x1x128xf32, #tpu.memory_space<vmem>>, vector<1x1x128xf32>,
    return
  }
  func.func @transform_0(%arg0: i32) -> (i32, i32, i32) {
    %c0_i32 = arith.constant 0 : i32
    %c0_i32_0 = arith.constant 0 : i32
    %c0_i32_1 = arith.constant 0 : i32
    return %arg0, %c0_i32, %c0_i32_0 : i32, i32, i32
  }
  func.func @transform_1(%arg0: i32) -> (i32, i32, i32) {
    %c0_i32 = arith.constant 0 : i32
    %c0_i32_0 = arith.constant 0 : i32
    %c0_i32_1 = arith.constant 0 : i32
    return %arg0, %c0_i32, %c0_i32_0 : i32, i32, i32
  }
  func.func @transform_2(%arg0: i32) -> (i32, i32, i32) {
    %c0_i32 = arith.constant 0 : i32
    %c0_i32_0 = arith.constant 0 : i32
    %c0_i32_1 = arith.constant 0 : i32
    return %arg0, %c0_i32, %c0_i32_0 : i32, i32, i32
  }
  func.func @transform_3(%arg0: i32) -> (i32, i32) {
    %c0_i32 = arith.constant 0 : i32
    %c0_i32_0 = arith.constant 0 : i32
    %c0_i32_1 = arith.constant 0 : i32
    return %c0_i32, %c0_i32_0 : i32, i32
  }
  func.func @transform_4(%arg0: i32) -> (i32, i32) {
    %c0_i32 = arith.constant 0 : i32
    %c0_i32_0 = arith.constant 0 : i32
    %c0_i32_1 = arith.constant 0 : i32
    return %c0_i32, %c0_i32_0 : i32, i32
  }
  func.func @transform_5(%arg0: i32) -> (i32, i32) {
    %c0_i32 = arith.constant 0 : i32
    %c0_i32_0 = arith.constant 0 : i32
    %c0_i32_1 = arith.constant 0 : i32
    return %c0_i32, %c0_i32_0 : i32, i32
  }
  func.func @transform_6(%arg0: i32) -> (i32, i32) {
    %c0_i32 = arith.constant 0 : i32
    %c0_i32_0 = arith.constant 0 : i32
    %c0_i32_1 = arith.constant 0 : i32
    return %c0_i32, %c0_i32_0 : i32, i32
  }
  func.func @transform_7(%arg0: i32) -> (i32, i32, i32) {
    %c0_i32 = arith.constant 0 : i32
    %c0_i32_0 = arith.constant 0 : i32
    %c0_i32_1 = arith.constant 0 : i32
    return %arg0, %c0_i32, %c0_i32_0 : i32, i32, i32
  }
}

</mosaic_0001>

<bundles_post_ra>
// kernel: graph_actor_critic_forward.1
= control target key start
LH: loop header
LB: loop body
LE: loop exit
PB: predicated region body
PF: predicated region fallthrough
CT: control target
= control target key end

     0   :  { %12 = vsyncpa [#allocation3], 0  ;;  %s1894_s0 = inlined_call_operand.vmem [shape: f32[2,8,16], index: 0, kind: input, shape index: {}]   ;;  %s1895_s1 = inlined_call_operand.hbm [shape: f32[2,8,8], index: 1, kind: input, shape index: {}]   ;;  %s1896_s2 = inlined_call_operand.vmem [shape: f32[2,1,2], index: 2, kind: input, shape index: {}]   ;;  %s1897_s3 = inlined_call_operand.vmem [shape: f32[80,64], index: 3, kind: input, shape index: {}]   ;;  %s1898_s4 = inlined_call_operand.hbm [shape: f32[208,128], index: 4, kind: input, shape index: {}]   ;;  %s1899_s5 = inlined_call_operand.vmem [shape: f32[128,128], index: 5, kind: input, shape index: {}]   ;;  %s1900_s6 = inlined_call_operand.vmem [shape: f32[8,128], index: 6, kind: input, shape index: {}]   ;;  %s1901_s7 = inlined_call_operand.vmem [shape: f32[2,1,128], index: 7, kind: output, shape index: {}]  }
   0x1   :  { %14 = vsyncpa [#allocation3 + $0x1], 0 }
   0x2   :  { %15 = vsyncpa [#allocation5], 0  ;;  %s1594_s24 = smov 0   ;;  %s1596_s25 = smov 0  }
   0x3   :  { %s1598_s26 = smov 0   ;;  %s1600_s27 = smov 0  }
   0x4 LB: > { %s1613_s28 = sadd.s32 4294967295, %s1545_s27   ;;  %p67_p0 = scmp.ne.s32.totalorder %s1537_s25, %s1533_s24  ;;  %s1545_s27 = sphi %s1600_s27, %s1916_s27   ;;  %s1541_s26 = sphi %s1598_s26, %s1915_s26   ;;  %s1537_s25 = sphi %s1596_s25, %s1914_s25   ;;  %s1533_s24 = sphi %s1594_s24, %s1913_s24  }
   0x5   : > { %p1902_p1 = scmp.eq.s32.totalorder %s1613_s28, 0  ;;  %p1093_p2 = scmp.ge.s32.totalorder %s1545_s27, 1 }
   0x6   : > { %p214_p3 = scmp.lt.s32.totalorder %s1545_s27, 3  ;;  %s1547_s8 = smov [#allocation4]  }
   0x7   : > { %p1621_p4 = por %p1902_p1, %p67_p0  ;;  %s229_s9 = sshll.u32 %s1547_s8, 4  ;;  %s230_s9 = int_to_ptr.vmem [resolvable:$true] %s229_s9 }
   0x8   : > { %p1625_p5 = pnand %p1093_p2, %p214_p3  ;;  %s1638_s11 = sadd.s32 1, %s1545_s27  }
   0x9   : > { %s1905_s29 = scalar_select %p1621_p4, 1, 0 }
   0xa   : > { %s1906_s30 = scalar_select %p1625_p5, 1, 0 }
   0xb   : > { %p1390_p6 = pneg %p1625_p5  ;;  %s54_s12 = sadd.s32 1, %s1541_s26 }
   0xc   : > { %s51_s13 = ssub.s32 %s1545_s27, %s1638_s11  ;;  %s1449_s16 = scalar_lea.hbm %s1898_s4, 3328 }
   0xd   : > { %p1633_p7 = pnand %p1390_p6, %p1902_p1  ;;  %p1450_p8 = scmp.ne.s32.totalorder %s1898_s4, %s1449_s16 }
   0xe   : > { %p1456_p12 = scmp.lt.u32.totalorder %s1449_s16, %s1898_s4 }
   0xf   : > { %p1451_p9 = pneg %p1633_p7 }
  0x11   : > { %p1452_p10 = pnand %p1451_p9, %p1450_p8 }
  0x13   : > { %p1453_p11 = pneg %p1452_p10 }
  0x15   : > { %p1458_p13 = pnand %p1456_p12, %p1453_p11 }
  0x17   : > { %1461 = shalt.err (!%p1458_p13)
}
  0x18   : > { %s1462_s21 = scalar_lea.vmem %s230_s9, 3328  ;;  %p1470_p6 = scmp.lt.s32.totalorder %s230_s9, %s230_s9 }
  0x19   : > { %p1463_p0 = scmp.ne.s32.totalorder %s230_s9, %s1462_s21  ;;  %p1471_p1 = scmp.lt.s32.totalorder %s1462_s21, %s1462_s21 }
  0x1b   : > { %p1465_p2 = pnand %p1463_p0, %p1451_p9  ;;  %p1472_p4 = por %p1471_p1, %p1470_p6 }
  0x1d   : > { %p1466_p3 = pneg %p1465_p2 }
  0x1f   : > { %p1473_p5 = pnand %p1472_p4, %p1466_p3 }
  0x21   : > { %1476 = shalt.err (!%p1473_p5)
}
  0x22   : > { %s1548_s22 = smov 128   ;;  %s1549_s23 = smov 8  }
  0x23   : > { %1393 = dma.hbm_to_vmem [thread:$0]  (!%p1633_p7), %s1898_s4, 3328, %s230_s9, [#allocation5], %s1548_s22, %s1548_s22, %s1549_s23  }
  0x24   : > { %p52_p8 = scmp.eq.s32.totalorder %s51_s13, 0  ;;  %p61_p9 = scmp.ne.s32.totalorder %s1541_s26, %s1537_s25 }
  0x25   : > { %p62_p1 = scmp.eq.s32.totalorder %s1545_s27, 0  ;;  %p1399_p4 = scmp.lt.s32.totalorder %s1545_s27, 2 }
  0x26   : > { %s1664_s14 = scalar_select %p52_p8, %s1541_s26, %s54_s12  }
  0x27   : > { %p63_p5 = por %p62_p1, %p61_p9  ;;  %s256_s15 = sand.u32 1, %s1541_s26  }
  0x28   : > { %s1096_s16 = sshll.u32 %s256_s15, 3  ;;  %s1097_s17 = sshll.u32 %s1545_s27, 7 }
  0x29   : > { %s1671_s20 = scalar_lea.hbm %s1895_s1, %s1097_s17  ;;  %s260_s9 = scalar_lea.vmem [#allocation2], %s1096_s16 }
  0x2a   : > { %s267_s10 = sshll.u32 %s260_s9, 4  ;;  %p1675_p7 = pnand %p1399_p4, %p63_p5  ;;  %s1673_s10 = int_to_ptr.vmem [resolvable:$true] %s267_s10 }
  0x2b   : > { %s257_s27 = scalar_lea.sflag [#allocation3], %s256_s15  ;;  %s1477_s13 = scalar_lea.hbm %s1671_s20, 128 }
  0x2c   : > { %p1478_p10 = scmp.ne.s32.totalorder %s1671_s20, %s1477_s13  ;;  %p1479_p11 = pneg %p1675_p7 }
  0x2d   : > { %s1482_s23 = scalar_lea.hbm %s1895_s1, 256  ;;  %p1483_p0 = scmp.lt.u32.totalorder %s1671_s20, %s1895_s1 }
  0x2e   : > { %p1480_p12 = pnand %p1479_p11, %p1478_p10  ;;  %p1484_p2 = scmp.lt.u32.totalorder %s1482_s23, %s1477_s13 }
  0x2f   : > { %p1486_p6 = scmp.lt.u32.totalorder %s1477_s13, %s1671_s20 }
  0x30   : > { %p1481_p13 = pneg %p1480_p12  ;;  %p1485_p3 = por %p1484_p2, %p1483_p0 }
  0x32   : > { %p1487_p8 = por %p1486_p6, %p1485_p3 }
  0x34   : > { %p1488_p9 = pnand %p1487_p8, %p1481_p13 }
  0x36   : > { %1491 = shalt.err (!%p1488_p9)
}
  0x37   : > { %s1492_s15 = scalar_lea.vmem %s1673_s10, 128  ;;  %s1550_s16 = smov [#allocation2]  }
  0x38   : > { %p1493_p1 = scmp.ne.s32.totalorder %s1673_s10, %s1492_s15  ;;  %s1497_s17 = sshll.u32 %s1550_s16, 4  ;;  %s1498_s17 = int_to_ptr.vmem [resolvable:$false] %s1497_s17 }
  0x39   : > { %s1499_s18 = scalar_lea.vmem %s1498_s17, 256  ;;  %p1500_p10 = scmp.lt.s32.totalorder %s1673_s10, %s1498_s17 }
  0x3a   : > { %p1495_p4 = pnand %p1493_p1, %p1479_p11  ;;  %p1501_p12 = scmp.lt.s32.totalorder %s1499_s18, %s1492_s15 }
  0x3c   : > { %p1496_p5 = pneg %p1495_p4  ;;  %p1502_p0 = por %p1501_p12, %p1500_p10 }
  0x3e   : > { %p1503_p2 = pnand %p1502_p0, %p1496_p5 }
  0x40   : > { %1506 = shalt.err (!%p1503_p2)
}
  0x41   : > { %1397 = dma.hbm_to_vmem [thread:$0]  (!%p1675_p7), %s1671_s20, 128, %s1673_s10, %s257_s27  }
  0x42   : > { %p1909_p13 = scmp.ne.s32.totalorder %s1906_s30, 0 }
  0x43   : > { %s284_s19 = sand.u32 (!%p1909_p13), 1, %s1537_s25   ;;  %p1910_p11 = scmp.ne.s32.totalorder (!%p1909_p13), %s1905_s29, 0 }
  0x44   : > { %282 = sbr.rel (%p1909_p13) target bundleno = 1630 (0x65e), region = 48  ;;  %s1099_s9 = sshll.u32 (!%p1909_p13), %s284_s19, 3 }
  0x45   : > { %s285_s13 = scalar_lea.sflag (!%p1909_p13), [#allocation3], %s284_s19  ;;  %s288_s21 = scalar_lea.vmem (!%p1909_p13), [#allocation2], %s1099_s9 }
  0x4b   : > { %1524 = dma.done.wait (%p1910_p11), %s285_s13, 128  }
  0x4c   : > { %1526 = vsyncadd (%p1910_p11), %s285_s13, 4294967168  ;;  %p1911_p3 = scmp.eq.s32.totalorder %s1613_s28, 0 }
  0x4e   : > { %1528 = dma.done.wait (%p1911_p3), [#allocation5], 3328   ;;  %p1912_p6 = pmov %p1911_p3 }
  0x4f   : > { %p328_p7 = scmp.lt.s32.totalorder %s1613_s28, 1  ;;  %v1551_v0 = vmov 0.0|0.0   ;;  %vm1552_vm0 = vmmov 0   ;;  %v1553_v1 = vmov 0.0   ;;  %v341_v2 = vld [vmem:[%s1897_s3] sm:$0xff]  ;;  %v342_v3 = vld [vmem:[%s1897_s3 + $0x8] sm:$0xff] }
  0x50   : > { %1530 = vsyncadd (%p1912_p6), [#allocation5], 4294963968  ;;  %1306 = vmatprep.subr.bf16.mxu0 %v1551_v0  ;;  %1178 = vmatprep.mubr.msk.f32.mxu0 %vm1552_vm0, %v1553_v1  ;;  %v1307_v4 = vpack.c.bf16 %v342_v3, %v341_v2  ;;  %vm399_vm1 = vcmask 130048   ;;  %v339_v6 = vld [vmem:[%s288_s21] sm:$0xff]  ;;  %vm477_vm2 = vcmask 64512   ;;  %v343_v9 = vld [vmem:[%s1897_s3 + $0x10] sm:$0xff] }
  0x51   : > { %s1918_s28 = smov (!%p328_p7, %s1613_s28), 1  ;;  %1181 = vmatprep.subr.mxu1 %v1553_v1  ;;  %1183 = vmatprep.mubr.msk.f32.mxu1 %vm1552_vm0, %v1553_v1  ;;  %v344_v10 = vld [vmem:[%s1897_s3 + $0x18] sm:$0xff]  ;;  %v345_v11 = vld [vmem:[%s1897_s3 + $0x20] sm:$0xff]  ;;  %v346_v13 = vld [vmem:[%s1897_s3 + $0x28] sm:$0xff]  ;;  %vm622_vm3 = vcmask 523264   ;;  %vm989_vm4 = vcmask 8192  }
  0x52   : > { %s1101_s29 = sshll.u32 %s1918_s28, 3  ;;  %1308 = vmatpush3.bf16.msra.mxu0 %v1307_v4  ;;  %v1310_v12 = vpack.c.bf16 %v344_v10, %v343_v9  ;;  %v1313_v14 = vpack.c.bf16 %v346_v13, %v345_v11  ;;  %v347_v15 = vld [vmem:[%s1897_s3 + $0x30] sm:$0xff]  ;;  %v348_v16 = vld [vmem:[%s1897_s3 + $0x38] sm:$0xff]  ;;  %v349_v18 = vld [vmem:[%s1897_s3 + $0x40] sm:$0xff]  ;;  %s334_s15 = scalar_lea.vmem %s1896_s2, %s1918_s28  ;;  %vm994_vm5 = vcmask 15360   ;;  %vm996_vm6 = vcmask 23552  }
  0x53   : > { %s331_s23 = scalar_lea.vmem %s1894_s0, %s1101_s29  ;;  %1309 = vmatprep.subr.bf16.mxu0 %v1551_v0  ;;  %v1316_v17 = vpack.c.bf16 %v348_v16, %v347_v15  ;;  %v350_v19 = vld [vmem:[%s1897_s3 + $0x48] sm:$0xff]  ;;  %v1103_v21 = vld [vmem:[%s1900_s6] ss:$0 sm:$0xff]  ;;  %v351_v26 = vld [vmem:[#allocation4] sm:$0xff]  ;;  %vm998_vm7 = vcmask 31744   ;;  %s337_s30 = scalar_lea.vmem %s1901_s7, %s1918_s28 }
  0x54   : > { %v1735_v5 = vld [vmem:[%s331_s23] sm:$0xff]  ;;  %v1319_v20 = vpack.c.bf16 %v350_v19, %v349_v18  ;;  %v352_v27 = vld [vmem:[#allocation4 + $0x8] sm:$0xff]  ;;  %v354_v32 = vld [vmem:[#allocation4 + $0x18] sm:$0xff] }
  0x55   : > { %1179 = vmatmul.mubr.msk.f32.vlgmr.msra.gmra.mrb[0].mxu0 %vm399_vm1, %v1735_v5  ;;  %v1322_v28 = vpack.c.bf16 %v352_v27, %v351_v26  ;;  %v353_v31 = vld [vmem:[#allocation4 + $0x10] sm:$0xff]  ;;  %v355_v34 = vld [vmem:[#allocation4 + $0x20] sm:$0xff]  ;;  %v356_v35 = vld [vmem:[#allocation4 + $0x28] sm:$0xff] }
  0x56   : > { %1207 = vmatprep.mubr.msk.f32.mxu0 %vm1552_vm0, %v1553_v1  ;;  %1311 = vmatpush3.bf16.msra.mxu0 %v1310_v12  ;;  %v1325_v33 = vpack.c.bf16 %v354_v32, %v353_v31  ;;  %v357_v36 = vld [vmem:[#allocation4 + $0x30] sm:$0xff]  ;;  %v1328_v37 = vpack.c.bf16 %v356_v35, %v355_v34  ;;  %v358_v38 = vld [vmem:[#allocation4 + $0x38] sm:$0xff]  ;;  %v375_v39 = vld [vmem:[#allocation4 + $0xc0] sm:$0xff] }
  0x57   : > { %1312 = vmatprep.subr.bf16.mxu0 %v1551_v0  ;;  %v376_v40 = vld [vmem:[#allocation4 + $0xc8] sm:$0xff]  ;;  %v1331_v42 = vpack.c.bf16 %v358_v38, %v357_v36  ;;  %v394_v43 = vld [vmem:[%s1900_s6 + $0x1] sm:$0x1]  ;;  %v359_v47 = vld [vmem:[#allocation4 + $0x40] sm:$0xff] }
  0x58   : > { %v1334_v41 = vpack.c.bf16 %v376_v40, %v375_v39  ;;  %v360_v48 = vld [vmem:[#allocation4 + $0x48] sm:$0xff]  ;;  %v361_v50 = vld [vmem:[#allocation4 + $0x50] sm:$0xff]  ;;  %v362_v51 = vld [vmem:[#allocation4 + $0x58] sm:$0xff] }
  0x59   : > { %v1337_v49 = vpack.c.bf16 %v360_v48, %v359_v47  ;;  %v1340_v53 = vpack.c.bf16 %v362_v51, %v361_v50  ;;  %v363_v54 = vld [vmem:[#allocation4 + $0x60] sm:$0xff]  ;;  %v364_v55 = vld [vmem:[#allocation4 + $0x68] sm:$0xff]  ;;  %v365_v57 = vld [vmem:[#allocation4 + $0x70] sm:$0xff] }
  0x5a   : > { %1314 = vmatpush3.bf16.msra.mxu0 %v1313_v14  ;;  %v1343_v56 = vpack.c.bf16 %v364_v55, %v363_v54  ;;  %v366_v58 = vld [vmem:[#allocation4 + $0x78] sm:$0xff]  ;;  %v367_v60 = vld [vmem:[#allocation4 + $0x80] sm:$0xff]  ;;  %v368_v61 = vld [vmem:[#allocation4 + $0x88] sm:$0xff] }
  0x5b   : > { %1315 = vmatprep.subr.bf16.mxu0 %v1551_v0  ;;  %v1346_v59 = vpack.c.bf16 %v366_v58, %v365_v57  ;;  %v1349_v63 = vpack.c.bf16 %v368_v61, %v367_v60  ;;  %v369_v2 = vld [vmem:[#allocation4 + $0x90] sm:$0xff]  ;;  %v370_v3 = vld [vmem:[#allocation4 + $0x98] sm:$0xff]  ;;  %v379_v13 = vld [vmem:[%s1899_s5 + $0x10] sm:$0xff] }
  0x5c   : > { %v1352_v4 = vpack.c.bf16 %v370_v3, %v369_v2  ;;  %v374_v9 = vld [vmem:[#allocation4 + $0xb8] sm:$0xff]  ;;  %v377_v11 = vld [vmem:[%s1899_s5] sm:$0xff]  ;;  %v380_v15 = vld [vmem:[%s1899_s5 + $0x18] sm:$0xff] }
  0x5d   : > { %v378_v12 = vld [vmem:[%s1899_s5 + $0x8] sm:$0xff]  ;;  %v1364_v16 = vpack.c.bf16 %v380_v15, %v379_v13  ;;  %v395_v27 = vld [vmem:[%s1900_s6 + $0x2] sm:$0x1]  ;;  %v387_v32 = vld [vmem:[%s1899_s5 + $0x50] sm:$0xff] }
  0x5e   : > { %1317 = vmatpush3.bf16.msra.mxu0 %v1316_v17  ;;  %v1361_v14 = vpack.c.bf16 %v378_v12, %v377_v11  ;;  %v381_v17 = vld [vmem:[%s1899_s5 + $0x20] sm:$0xff]  ;;  %v382_v18 = vld [vmem:[%s1899_s5 + $0x28] sm:$0xff]  ;;  %v391_v38 = vld [vmem:[%s1899_s5 + $0x70] sm:$0xff] }
  0x5f   : > { %1318 = vmatprep.subr.bf16.mxu0 %v1551_v0  ;;  %v1367_v19 = vpack.c.bf16 %v382_v18, %v381_v17  ;;  %v389_v35 = vld [vmem:[%s1899_s5 + $0x60] sm:$0xff]  ;;  %v390_v36 = vld [vmem:[%s1899_s5 + $0x68] sm:$0xff]  ;;  %v392_v39 = vld [vmem:[%s1899_s5 + $0x78] sm:$0xff] }
  0x60   : > { %v1382_v40 = vpack.c.bf16 %v392_v39, %v391_v38  ;;  %v397_v58 = vld [vmem:[%s1900_s6 + $0x4] sm:$0x1] }
  0x62   : > { %1320 = vmatpush3.bf16.msra.mxu0 %v1319_v20  ;;  %v383_v20 = vld [vmem:[%s1899_s5 + $0x30] sm:$0xff] }
  0x63   : > { %1333 = vmatprep.subr.bf16.mxu0 %v1551_v0 }
 0x128   : > { %v469_v7 = vpop.f32.mrb[0].mxu0 }
 0x129   : > { %v1180_v8 = vpop.f32.mrb[1].mxu0  ;;  %1182 = vmatpush3.msra.mxu1 %v469_v7 }
 0x12a   : > { %1184 = vmatmul.mubr.msk.f32.vlgmr.msra.gmra.mrb[0].mxu1 %vm477_vm2, %v339_v6  ;;  %1186 = vmatprep.subr.mxu1 %v1553_v1  ;;  %v373_v8 = vld [vmem:[#allocation4 + $0xb0] sm:$0xff] }
 0x12b   : > { %1188 = vmatprep.mubr.msk.f32.mxu1 %vm1552_vm0, %v1553_v1  ;;  %v1358_v10 = vpack.c.bf16 %v374_v9, %v373_v8 }
 0x1fd   : > { %v547_v22 = vpop.f32.mrb[0].mxu1 }
 0x1fe   : > { %v548_v23 = vadd.f32 %v1103_v21, %v547_v22  ;;  %v1185_v24 = vpop.f32.mrb[1].mxu1  ;;  %v384_v21 = vld [vmem:[%s1899_s5 + $0x38] sm:$0xff] }
 0x1ff   : > { %v1370_v22 = vpack.c.bf16 %v384_v21, %v383_v20  ;;  %v386_v24 = vld [vmem:[%s1899_s5 + $0x48] sm:$0xff] }
 0x200   : > { %1439 = vtanh.f32 %v548_v23  ;;  %v385_v23 = vld [vmem:[%s1899_s5 + $0x40] sm:$0xff] }
 0x20a   : > { %v1440_v25 = vpop.eup %1439 }
 0x20b   : > { %1187 = vmatpush3.msra.mxu1 %v1440_v25  ;;  %v1373_v25 = vpack.c.bf16 %v386_v24, %v385_v23 }
 0x20c   : > { %1189 = vmatmul.mubr.msk.f32.vlgmr.msra.gmra.mrb[2].mxu1 %vm477_vm2, %v339_v6  ;;  %1321 = vmatprep.subr.bf16.mxu1 %v1551_v0  ;;  %v372_v6 = vld [vmem:[#allocation4 + $0xa8] sm:$0xff] }
 0x20d   : > { %1226 = vmatprep.mubr.msk.f32.mxu1 %vm1552_vm0, %v1553_v1  ;;  %1323 = vmatpush3.bf16.msra.mxu1 %v1322_v28 }
 0x20e   : > { %1324 = vmatprep.subr.bf16.mxu1 %v1551_v0 }
 0x211   : > { %1326 = vmatpush3.bf16.msra.mxu1 %v1325_v33  ;;  %v388_v33 = vld [vmem:[%s1899_s5 + $0x58] sm:$0xff] }
 0x212   : > { %1327 = vmatprep.subr.bf16.mxu1 %v1551_v0  ;;  %v1376_v34 = vpack.c.bf16 %v388_v33, %v387_v32 }
 0x215   : > { %1329 = vmatpush3.bf16.msra.mxu1 %v1328_v37  ;;  %v1379_v37 = vpack.c.bf16 %v390_v36, %v389_v35 }
 0x216   : > { %1330 = vmatprep.subr.bf16.mxu1 %v1551_v0 }
 0x219   : > { %1332 = vmatpush3.bf16.msra.mxu1 %v1331_v42 }
 0x21a   : > { %1336 = vmatprep.subr.bf16.mxu1 %v1551_v0 }
 0x2df   : > { %v618_v29 = vpop.f32.mrb[2].mxu1 }
 0x2e0   : > { %v1190_v30 = vpop.f32.mrb[3].mxu1  ;;  %1208 = vmatmul.mubr.msk.f32.vlgmr.msra.gmra.mrb[2].mxu0 %vm622_vm3, %v618_v29 }
 0x2e1   : > { %1233 = vmatprep.mubr.msk.f32.mxu0 %vm1552_vm0, %v1553_v1  ;;  %1335 = vmatpush3.bf16.msra.mxu0 %v1334_v41  ;;  %v340_v41 = vld [vmem:[%s334_s15] sm:$0x1] }
 0x2e2   : > { %1360 = vmatprep.subr.bf16.mxu0 %v1551_v0  ;;  %v985_v42 = vmul.f32 -0.5, %v340_v41 }
 0x2e4   : > { %1234 = vmatmul.mubr.msk.f32.vlgmr.msra.gmra.mrb[4].mxu0 %vm399_vm1, %v1735_v5  ;;  %v371_v5 = vld [vmem:[#allocation4 + $0xa0] sm:$0xff] }
 0x2e5   : > { %1303 = vmatprep.mubr.msk.f32.mxu0 %vm1552_vm0, %v1553_v1  ;;  %v1355_v7 = vpack.c.bf16 %v372_v6, %v371_v5  ;;  %1362 = vmatpush3.bf16.msra.mxu0 %v1361_v14 }
 0x2e6   : > { %1363 = vmatprep.subr.bf16.mxu0 %v1551_v0 }
 0x2e9   : > { %1365 = vmatpush3.bf16.msra.mxu0 %v1364_v16 }
 0x2ea   : > { %1366 = vmatprep.subr.bf16.mxu0 %v1551_v0 }
 0x2ed   : > { %1368 = vmatpush3.bf16.msra.mxu0 %v1367_v19 }
 0x2ee   : > { %1369 = vmatprep.subr.bf16.mxu0 %v1551_v0 }
 0x2f1   : > { %1371 = vmatpush3.bf16.msra.mxu0 %v1370_v22 }
 0x2f2   : > { %1372 = vmatprep.subr.bf16.mxu0 %v1551_v0 }
 0x2f5   : > { %1374 = vmatpush3.bf16.msra.mxu0 %v1373_v25 }
 0x2f6   : > { %1375 = vmatprep.subr.bf16.mxu0 %v1551_v0 }
 0x2f9   : > { %1377 = vmatpush3.bf16.msra.mxu0 %v1376_v34 }
 0x2fa   : > { %1378 = vmatprep.subr.bf16.mxu0 %v1551_v0 }
 0x2fd   : > { %1380 = vmatpush3.bf16.msra.mxu0 %v1379_v37 }
 0x2fe   : > { %1381 = vmatprep.subr.bf16.mxu0 %v1551_v0 }
 0x301   : > { %1383 = vmatpush3.bf16.msra.mxu0 %v1382_v40 }
 0x3b3   : > { %v692_v44 = vpop.f32.mrb[2].mxu0 }
 0x3b4   : > { %v693_v45 = vadd.f32 %v692_v44, %v394_v43  ;;  %v1209_v46 = vpop.f32.mrb[3].mxu0  ;;  %v398_v43 = vld [vmem:[%s1900_s6 + $0x5] sm:$0x1]  ;;  %v986_v44 = vmul.f32 %v985_v42, %v340_v41 }
 0x3b6   : > { %1441 = vtanh.f32 %v693_v45  ;;  %v987_v45 = vsub.f32 %v986_v44, %v398_v43 }
 0x3b7   : > { %v836_v62 = vpop.f32.mrb[4].mxu0 }
 0x3b8   : > { %v1109_v46 = vadd.f32 -0.9189385, %v987_v45 }
 0x3ba   : > { %v990_v47 = vsel %vm989_vm4, %v1109_v46, 0.0 }
 0x3bb   : > { %991 = vadd.xlane.f32.xlu0 %v990_v47 }
 0x3c0   : > { %v1442_v52 = vpop.eup %1441 }
 0x3c1   : > { %1227 = vmatmul.mubr.msk.f32.vlgmr.msra.gmra.mrb[4].mxu1 %vm622_vm3, %v1442_v52  ;;  %v983_v52 = vmul.f32 1.442695, %v398_v43 }
 0x3c2   : > { %1338 = vmatpush3.bf16.msra.mxu1 %v1337_v49  ;;  %1268 = vmatprep.mubr.msk.f32.mxu1 %vm1552_vm0, %v1553_v1  ;;  %v1235_v1 = vpop.f32.mrb[5].mxu0 }
 0x3c3   : > { %1339 = vmatprep.subr.bf16.mxu1 %v1551_v0 }
 0x3c6   : > { %1341 = vmatpush3.bf16.msra.mxu1 %v1340_v53 }
 0x3c7   : > { %1342 = vmatprep.subr.bf16.mxu1 %v1551_v0 }
 0x3ca   : > { %1344 = vmatpush3.bf16.msra.mxu1 %v1343_v56 }
 0x3cb   : > { %1345 = vmatprep.subr.bf16.mxu1 %v1551_v0 }
 0x3ce   : > { %1347 = vmatpush3.bf16.msra.mxu1 %v1346_v59 }
 0x3cf   : > { %1348 = vmatprep.subr.bf16.mxu1 %v1551_v0 }
 0x3d2   : > { %1350 = vmatpush3.bf16.msra.mxu1 %v1349_v63 }
 0x3d3   : > { %1351 = vmatprep.subr.bf16.mxu1 %v1551_v0 }
 0x3d6   : > { %1353 = vmatpush3.bf16.msra.mxu1 %v1352_v4 }
 0x3d7   : > { %1354 = vmatprep.subr.bf16.mxu1 %v1551_v0 }
 0x3da   : > { %1356 = vmatpush3.bf16.msra.mxu1 %v1355_v7 }
 0x3db   : > { %1357 = vmatprep.subr.bf16.mxu1 %v1551_v0  ;;  %v396_v0 = vld [vmem:[%s1900_s6 + $0x3] sm:$0x1] }
 0x3de   : > { %1359 = vmatpush3.bf16.msra.mxu1 %v1358_v10 }
 0x448   : > { %v992_v55 = vpop.xlane.xlu0 %991 }
 0x494   : > { %v766_v26 = vpop.f32.mrb[4].mxu1 }
 0x495   : > { %v837_v28 = vadd.f32 %v836_v62, %v766_v26  ;;  %v1228_v29 = vpop.f32.mrb[5].mxu1 }
 0x497   : > { %v840_v30 = vadd.f32 %v837_v28, %v395_v27 }
 0x499   : > { %1443 = vtanh.f32 %v840_v30 }
 0x4a3   : > { %v1444_v31 = vpop.eup %1443 }
 0x4a4   : > { %1269 = vmatmul.mubr.f32.vlgmr.msra.gmra.mrb[6].mxu1 %v1444_v31 }
 0x577   : > { %v908_v48 = vpop.f32.mrb[6].mxu1 }
 0x578   : > { %v909_v49 = vadd.f32 %v908_v48, %v396_v0  ;;  %v1270_v50 = vpop.f32.mrb[7].mxu1 }
 0x57a   : > { %1445 = vtanh.f32 %v909_v49 }
 0x57b   : > { %1447 = vpow2.f32 %v983_v52 }
 0x584   : > { %v1446_v51 = vpop.eup %1445 }
 0x585   : > { %1304 = vmatmul.mubr.f32.vlgmr.msra.gmra.mrb[6].mxu0 %v1446_v51  ;;  %v1448_v53 = vpop.eup %1447 }
 0x586   : > { %v993_v54 = vmul.f32 %v1448_v53, %v340_v41 }
 0x588   : > { %v995_v56 = vsel %vm994_vm5, %v993_v54, 0.0 }
 0x589   : > { %v997_v57 = vsel %vm996_vm6, %v995_v56, %v992_v55 }
 0x58a   : > { %v999_v60 = vsel %vm998_vm7, %v997_v57, 0.0 }
 0x658   : > { %v979_v59 = vpop.f32.mrb[6].mxu0 }
 0x659   : > { %v980_v61 = vadd.f32 %v979_v59, %v397_v58  ;;  %v1305_v62 = vpop.f32.mrb[7].mxu0 }
 0x65b   : > { %v1000_v63 = vadd.f32 %v999_v60, %v980_v61 }
 0x65d   : > { %1001 = vst [vmem:[%s337_s30] sm:$0x1] %v1000_v63 }
 0x65e PF: > { %p18_p8 = scmp.ge.s32.totalorder %s1638_s11, 4   ;;  %s1913_s24 = smov %s1537_s25 }
 0x65f   : > { %s1914_s25 = smov %s1541_s26  ;;  %s1915_s26 = smov %s1664_s14 }
 0x660   : > { %s1916_s27 = smov %s1638_s11  ;;  %20 = sbr.rel (!%p18_p8) target bundleno = 4 (0x4), region = 98 }
 0x667   :  { %1019 = vsyncpa [#allocation3], 1 }
 0x668   :  { %1021 = vsyncpa [#allocation3 + $0x1], 1 }
 0x669   :  { %1022 = vsyncpa [#allocation5], 1 }

</bundles_post_ra>
